<compile_context>
chip_gen: v5e
topology: v5e:2x2
jax: 0.10.0
libtpu: 0.0.40
codegen_flags: <defaults>
</compile_context>

<pallas_src>
import functools

import jax
import jax.numpy as jnp
from jax import lax
from jax.experimental import pallas as pl
from jax.experimental.pallas import tpu as pltpu

_LANE = 128
_VMEM_LIMIT_BYTES = 48 * 1024 * 1024          # <= v7x 64 MiB physical


def _round_up(n, m):
    return ((n + m - 1) // m) * m


# ---------------------------------------------------------------------------
# Path A: the full feature dim fits in VMEM -> one dot per batch tile.
#   x_ref: [tile_b, F]   w_ref: [c_pad, F] (resident)   b_ref: [1, c_pad] f32
#   o_ref: [tile_b, c_pad]
# ---------------------------------------------------------------------------
def _linear_kernel_fullf(x_ref, w_ref, b_ref, o_ref):
    acc = lax.dot_general(
        x_ref[...], w_ref[...],
        dimension_numbers=(((1,), (1,)), ((), ())),   # contract shared F axis
        preferred_element_type=jnp.float32)
    o_ref[...] = (acc + b_ref[...]).astype(o_ref.dtype)


# ---------------------------------------------------------------------------
# Path B: K-tiled reduction for very large in_features.
# ---------------------------------------------------------------------------
def _linear_kernel_ktiled(x_ref, w_ref, b_ref, o_ref, *scratch,
                          tile_k, w_resident, use_scratch):
    acc_ref = scratch[0] if use_scratch else o_ref   # f32 accumulator
    k = pl.program_id(1)

    @pl.when(k == 0)
    def _():
        # Fold the bias into the accumulator init: no epilogue add needed.
        acc_ref[...] = jnp.broadcast_to(
            b_ref[...], acc_ref.shape).astype(acc_ref.dtype)

    if w_resident:
        off = pl.multiple_of(k * tile_k, tile_k)
        w_tile = w_ref[:, pl.ds(off, tile_k)]
    else:
        w_tile = w_ref[...]

    acc_ref[...] += lax.dot_general(
        x_ref[...], w_tile,
        dimension_numbers=(((1,), (1,)), ((), ())),
        preferred_element_type=jnp.float32)

    if use_scratch:
        @pl.when(k == pl.num_programs(1) - 1)
        def _():
            o_ref[...] = acc_ref[...].astype(o_ref.dtype)


def logistic_regression_forward(x, weight, bias, *,
                                compute_dtype=jnp.bfloat16,
                                vmem_budget_bytes=40 * 1024 * 1024):
    """y = x @ weight.T + bias  (torch.nn.Linear semantics).

    x: [B, in_features], weight: [num_classes, in_features] (PyTorch layout),
    bias: [num_classes]  ->  [B, num_classes] in x.dtype.
    """
    B, F = x.shape
    C, F2 = weight.shape
    assert F == F2, (F, F2)
    out_dtype = x.dtype
    out_size = jnp.dtype(out_dtype).itemsize

    cd = jnp.dtype(compute_dtype) if compute_dtype is not None else jnp.dtype(x.dtype)
    cd_size = cd.itemsize

    # Cast the streamed operands at the wrapper boundary (HBM arrays are in
    # the compute dtype).  Accumulation stays f32 inside the kernel.
    xc = x.astype(cd)
    wc = weight.astype(cd)

    # Lane-dense (multiple-of-128) class dim: weight/bias are tiny, padding
    # them is cheap, and the output store stays an unmasked vst.  Neither x
    # nor the batch dim is ever padded.
    c_pad = _round_up(C, _LANE)
    if c_pad != C:
        wc = jnp.pad(wc, ((0, c_pad - C), (0, 0)))
        bc = jnp.pad(bias.astype(jnp.float32), (0, c_pad - C))
    else:
        bc = bias.astype(jnp.float32)
    bc = bc.reshape(1, c_pad)

    # Batch tile: sublane aligned (16 rows for packed bf16); when B allows it,
    # use >= 2 tiles so a v7x megacore can shard the "parallel" axis across
    # both TensorCores.  Ragged last block is clipped by Pallas on write-back.
    sub = 16 if cd_size < 4 else 8
    if B <= 2 * sub:
        tile_b = B                                   # single block == full dim
    else:
        tile_b = min(512, _round_up(pl.cdiv(B, 2), sub))
    nb = pl.cdiv(B, tile_b)

    # Explicit VMEM plan: 2 pipelined buffers per input/output + optional acc.
    use_scratch = out_dtype != jnp.float32
    base_bytes = (2 * tile_b * c_pad * out_size              # output
                  + 2 * c_pad * 4                            # bias (f32)
                  + (tile_b * c_pad * 4 if use_scratch else 0))

    def fits(x_f, w_f):
        return (base_bytes
                + 2 * tile_b * x_f * cd_size
                + 2 * c_pad * w_f * cd_size) <= vmem_budget_bytes

    vmem_spec = pltpu.MemorySpace.VMEM

    if fits(F, F):
        # -------- Path A: no reduction axis, weight fully resident ----------
        out = pl.pallas_call(
            _linear_kernel_fullf,
            out_shape=jax.ShapeDtypeStruct((B, c_pad), out_dtype),
            grid=(nb,),
            in_specs=[
                pl.BlockSpec((tile_b, F), lambda i: (i, 0), memory_space=vmem_spec),
                pl.BlockSpec((c_pad, F), lambda i: (0, 0), memory_space=vmem_spec),
                pl.BlockSpec((1, c_pad), lambda i: (0, 0), memory_space=vmem_spec),
            ],
            out_specs=pl.BlockSpec((tile_b, c_pad), lambda i: (i, 0),
                                   memory_space=vmem_spec),
            compiler_params=pltpu.CompilerParams(
                dimension_semantics=("parallel",),
                vmem_limit_bytes=_VMEM_LIMIT_BYTES),
        )(xc, wc, bc)
    else:
        # -------- Path B: K-tiled reduction ---------------------------------
        f_128 = _round_up(F, _LANE)
        # Prefer keeping the whole weight resident across the grid (fetched
        # from HBM once instead of once per batch tile).
        w_resident = fits(_LANE, f_128)

        tile_k = 2048
        while tile_k > _LANE:
            f_pad_try = _round_up(F, tile_k)
            if fits(tile_k, f_pad_try if w_resident else tile_k):
                break
            tile_k //= 2
        f_pad = _round_up(F, tile_k)
        nk = f_pad // tile_k

        if f_pad != F:
            # Zero padding of the contraction dim contributes nothing.
            # TODO(synk): for very large misaligned F, mask the last K tile
            # in-kernel instead of this extra HBM round trip over x.
            xc = jnp.pad(xc, ((0, 0), (0, f_pad - F)))
            wc = jnp.pad(wc, ((0, 0), (0, f_pad - F)))

        if w_resident:
            w_spec = pl.BlockSpec((c_pad, f_pad), lambda i, k: (0, 0),
                                  memory_space=vmem_spec)
        else:
            w_spec = pl.BlockSpec((c_pad, tile_k), lambda i, k: (0, k),
                                  memory_space=vmem_spec)

        kernel = functools.partial(_linear_kernel_ktiled, tile_k=tile_k,
                                   w_resident=w_resident,
                                   use_scratch=use_scratch)
        scratch_shapes = ([pltpu.VMEM((tile_b, c_pad), jnp.float32)]
                          if use_scratch else [])

        out = pl.pallas_call(
            kernel,
            out_shape=jax.ShapeDtypeStruct((B, c_pad), out_dtype),
            grid=(nb, nk),
            in_specs=[
                pl.BlockSpec((tile_b, tile_k), lambda i, k: (i, k),
                             memory_space=vmem_spec),
                w_spec,
                pl.BlockSpec((1, c_pad), lambda i, k: (0, 0),
                             memory_space=vmem_spec),
            ],
            out_specs=pl.BlockSpec((tile_b, c_pad), lambda i, k: (i, 0),
                                   memory_space=vmem_spec),
            scratch_shapes=scratch_shapes,
            compiler_params=pltpu.CompilerParams(
                dimension_semantics=("parallel", "arbitrary"),
                vmem_limit_bytes=_VMEM_LIMIT_BYTES),
        )(xc, wc, bc)

    return out if c_pad == C else out[:, :C]


if __name__ == "__main__":
    # Small shapes consistent with the module: batch=8, in_features=32, classes=10
    batch, in_features, num_classes = 8, 32, 10

    key = jax.random.PRNGKey(0)
    kx, kw, kb = jax.random.split(key, 3)

    x = jax.random.normal(kx, (batch, in_features), dtype=jnp.float32)
    bound = 1.0 / (in_features ** 0.5)
    weight = jax.random.uniform(kw, (num_classes, in_features),
                                minval=-bound, maxval=bound, dtype=jnp.float32)
    bias = jax.random.uniform(kb, (num_classes,),
                              minval=-bound, maxval=bound, dtype=jnp.float32)

    y_ref = x @ weight.T + bias

    # 1) Default (bf16 streams, f32 accumulation) -> Path A, resident weight.
    y = logistic_regression_forward(x, weight, bias)
    jax.block_until_ready(y)
    assert y.shape == (batch, num_classes), y.shape
    assert jnp.allclose(y, y_ref, atol=5e-2, rtol=5e-2), \
        float(jnp.max(jnp.abs(y - y_ref)))

    # 2) Pure f32 compute path: exact match against the reference.
    y32 = logistic_regression_forward(x, weight, bias, compute_dtype=jnp.float32)
    jax.block_until_ready(y32)
    assert jnp.allclose(y32, y_ref, atol=1e-5, rtol=1e-5)

    # 3) Force the K-tiled path (tiny VMEM budget): ragged batch, misaligned
    #    in_features, f32 accumulate-directly-into-output, bias in the init.
    b2, f2, c2 = 40, 300, 10
    k2x, k2w, k2b = jax.random.split(jax.random.PRNGKey(1), 3)
    x2 = jax.random.normal(k2x, (b2, f2), dtype=jnp.float32)
    w2 = jax.random.normal(k2w, (c2, f2), dtype=jnp.float32) * 0.05
    bi2 = jax.random.normal(k2b, (c2,), dtype=jnp.float32)
    y2 = logistic_regression_forward(x2, w2, bi2, compute_dtype=jnp.float32,
                                     vmem_budget_bytes=64 * 1024)
    jax.block_until_ready(y2)
    assert jnp.allclose(y2, x2 @ w2.T + bi2, atol=1e-4, rtol=1e-4)

    # 4) K-tiled path with the weight held resident in VMEM across k steps.
    b3, f3, c3 = 128, 512, 10
    k3x, k3w, k3b = jax.random.split(jax.random.PRNGKey(2), 3)
    x3 = jax.random.normal(k3x, (b3, f3), dtype=jnp.float32)
    w3 = jax.random.normal(k3w, (c3, f3), dtype=jnp.float32) * 0.05
    bi3 = jax.random.normal(k3b, (c3,), dtype=jnp.float32)
    y3 = logistic_regression_forward(x3, w3, bi3, compute_dtype=jnp.float32,
                                     vmem_budget_bytes=800 * 1024)
    jax.block_until_ready(y3)
    assert jnp.allclose(y3, x3 @ w3.T + bi3, atol=1e-4, rtol=1e-4)

    # 5) bf16 inputs: K-tiled path using the f32 VMEM scratch accumulator.
    xb = x2.astype(jnp.bfloat16)
    wb = w2.astype(jnp.bfloat16)
    y4 = logistic_regression_forward(xb, wb, bi2, vmem_budget_bytes=64 * 1024)
    jax.block_until_ready(y4)
    ref4 = xb.astype(jnp.float32) @ wb.astype(jnp.float32).T + bi2
    assert jnp.allclose(y4.astype(jnp.float32), ref4, atol=5e-2, rtol=5e-2)

    # TODO(synk): the PyTorch module applies no sigmoid/softmax (nn.Linear only);
    # if probabilities are ever needed, fuse jax.nn.softmax into the epilogue.
    print("KERNEL_OK")
</pallas_src>

<mosaic_0001>
module attributes {stable_mosaic.version = 11 : i64} {
  func.func @_linear_kernel_fullf(%arg0: i32, %arg1: memref<8x32xbf16, #tpu.memory_space<vmem>>, %arg2: memref<128x32xbf16, #tpu.memory_space<vmem>>, %arg3: memref<1x128xf32, #tpu.memory_space<vmem>>, %arg4: memref<8x128xf32, #tpu.memory_space<vmem>>) attributes {dimension_semantics = [#tpu.dimension_semantics<parallel>], iteration_bounds = array<i64: 1>, scalar_prefetch = 0 : i64, scratch_operands = 0 : i64, tpu.core_type = #tpu.core_type<tc>, window_params = [{transform_indices = @transform_0, window_bounds = array<i64: 8, 32>}, {pipeline_mode = #tpu.pipeline_mode<synchronous>, transform_indices = @transform_1, window_bounds = array<i64: 128, 32>}, {pipeline_mode = #tpu.pipeline_mode<synchronous>, transform_indices = @transform_2, window_bounds = array<i64: 1, 128>}, {transform_indices = @transform_3, window_bounds = array<i64: 8, 128>}]} {
    %c0 = arith.constant 0 : index
    %c0_0 = arith.constant 0 : index
    %0 = vector.load %arg1[%c0, %c0_0] : memref<8x32xbf16, #tpu.memory_space<vmem>>, vector<8x32xbf16>
    %c0_1 = arith.constant 0 : index
    %c0_2 = arith.constant 0 : index
    %1 = vector.load %arg2[%c0_1, %c0_2] : memref<128x32xbf16, #tpu.memory_space<vmem>>, vector<128x32xbf16>
    %cst = arith.constant dense<0.000000e+00> : vector<8x128xf32>
    %2 = tpu.matmul %0, %1, %cst {dimension_numbers = #tpu.dot_dimension_numbers<[1], [1], [0], [0], [0, 0, 1, 0], [], []>} : vector<8x32xbf16>, vector<128x32xbf16>, vector<8x128xf32> -> vector<8x128xf32>
    %c0_3 = arith.constant 0 : index
    %c0_4 = arith.constant 0 : index
    %3 = vector.load %arg3[%c0_3, %c0_4] : memref<1x128xf32, #tpu.memory_space<vmem>>, vector<1x128xf32>
    %4 = vector.broadcast %3 : vector<1x128xf32> to vector<8x128xf32>
    %5 = arith.addf %2, %4 : vector<8x128xf32>
    %c0_5 = arith.constant 0 : index
    %c0_6 = arith.constant 0 : index
    %6 = vector.load %arg4[%c0_5, %c0_6] : memref<8x128xf32, #tpu.memory_space<vmem>>, vector<8x128xf32>
    tpu.vector_store %arg4[%c0_5, %c0_6], %5 {strides = array<i32>} : memref<8x128xf32, #tpu.memory_space<vmem>>, vector<8x128xf32>,
    return
  }
  func.func @transform_0(%arg0: i32) -> (i32, i32) {
    %c0_i32 = arith.constant 0 : i32
    %c0_i32_0 = arith.constant 0 : i32
    return %arg0, %c0_i32 : i32, i32
  }
  func.func @transform_1(%arg0: i32) -> (i32, i32) {
    %c0_i32 = arith.constant 0 : i32
    %c0_i32_0 = arith.constant 0 : i32
    %c0_i32_1 = arith.constant 0 : i32
    return %c0_i32, %c0_i32_0 : i32, i32
  }
  func.func @transform_2(%arg0: i32) -> (i32, i32) {
    %c0_i32 = arith.constant 0 : i32
    %c0_i32_0 = arith.constant 0 : i32
    %c0_i32_1 = arith.constant 0 : i32
    return %c0_i32, %c0_i32_0 : i32, i32
  }
  func.func @transform_3(%arg0: i32) -> (i32, i32) {
    %c0_i32 = arith.constant 0 : i32
    %c0_i32_0 = arith.constant 0 : i32
    return %arg0, %c0_i32 : i32, i32
  }
}

</mosaic_0001>

<bundles_post_ra>
// kernel: tpu_custom_call.1
= control target key start
LH: loop header
LB: loop body
LE: loop exit
PB: predicated region body
PF: predicated region fallthrough
CT: control target
= control target key end

     0   :  { %vm76_vm0 = vcmask 261120   ;;  %s266_s0 = inlined_call_operand.vmem [shape: bf16[8,32], index: 0, kind: input, shape index: {}]   ;;  %s267_s1 = inlined_call_operand.vmem [shape: bf16[128,32], index: 1, kind: input, shape index: {}]   ;;  %s268_s2 = inlined_call_operand.vmem [shape: f32[1,128], index: 2, kind: input, shape index: {}]   ;;  %s269_s3 = inlined_call_operand.hbm [shape: f32[8,128], index: 3, kind: output, shape index: {}]  }
   0x1   :  { %v174_v0 = vld [vmem:[%s267_s1 + $0x38] sm:$0xff] }
   0x2   :  { %v102_v1 = vsel %vm76_vm0, %v174_v0, 0 }
   0x3   :  { %8 = vsyncpa [#allocation3], 0  ;;  %104 = vmatpush.bf16.xpose.msra.mxu0 %v102_v1  ;;  %v173_v2 = vld [vmem:[%s267_s1 + $0x30] sm:$0xff]  ;;  %v172_v4 = vld [vmem:[%s267_s1 + $0x28] sm:$0xff]  ;;  %s203_s5 = smov [#allocation2]   ;;  %s125_s9 = sshll.u32 %s269_s3, 4  ;;  %s126_s9 = int_to_ptr.hbm [resolvable:$true] %s125_s9 }
   0x4   :  { %v99_v3 = vsel %vm76_vm0, %v173_v2, 0  ;;  %v96_v5 = vsel %vm76_vm0, %v172_v4, 0  ;;  %v171_v6 = vld [vmem:[%s267_s1 + $0x20] sm:$0xff]  ;;  %v170_v8 = vld [vmem:[%s267_s1 + $0x18] sm:$0xff]  ;;  %v169_v10 = vld [vmem:[%s267_s1 + $0x10] sm:$0xff]  ;;  %s123_s6 = sshll.u32 %s203_s5, 4  ;;  %s124_s6 = int_to_ptr.vmem [resolvable:$true] %s123_s6 }
   0x5   :  { %v93_v7 = vsel %vm76_vm0, %v171_v6, 0  ;;  %v90_v9 = vsel %vm76_vm0, %v170_v8, 0  ;;  %v87_v11 = vsel %vm76_vm0, %v169_v10, 0  ;;  %v168_v12 = vld [vmem:[%s267_s1 + $0x8] sm:$0xff]  ;;  %v167_v14 = vld [vmem:[%s267_s1] sm:$0xff] }
   0x6   :  { %v84_v13 = vsel %vm76_vm0, %v168_v12, 0  ;;  %v81_v15 = vsel %vm76_vm0, %v167_v14, 0  ;;  %v15_v16 = vld [vmem:[%s266_s0] sm:$0xf] }
   0x7   :  { %v176_v17 = vld [vmem:[%s268_s2] ss:$0 sm:$0xff] }
   0xb   :  { %105 = vmatpush.bf16.xpose.msra.mxu0 %v99_v3 }
  0x13   :  { %106 = vmatpush.bf16.xpose.msra.mxu0 %v96_v5 }
  0x1b   :  { %107 = vmatpush.bf16.xpose.msra.mxu0 %v93_v7 }
  0x23   :  { %108 = vmatpush.bf16.xpose.msra.mxu0 %v90_v9 }
  0x2b   :  { %109 = vmatpush.bf16.xpose.msra.mxu0 %v87_v11 }
  0x33   :  { %110 = vmatpush.bf16.xpose.msra.mxu0 %v84_v13 }
  0x3b   :  { %111 = vmatpush.bf16.xpose.msra.mxu0 %v81_v15 }
  0x42   :  { %166 = vmatmul.msk.bf16.vlgmr.msra.gmra.mxu0 %vm76_vm0, %v15_v16 }
  0xbf   :  { %v113_v18 = vpop.f32.mrf.mxu0 }
  0xc0   :  { %v114_v19 = vadd.f32 %v176_v17, %v113_v18 }
  0xc2   :  { %117 = vst [vmem:[#allocation2] sm:$0xff] %v114_v19 }
  0xc3   :  { %128 = dma.vmem_to_hbm [thread:$0]  %s124_s6, 128, %s126_s9, [#allocation3]  }
  0xc7   :  { %v115_v20 = vpop.f32.mrf.mxu0 }
  0xc8   :  { %201 = dma.done.wait [#allocation3], 128  }
  0xc9   :  { %202 = vsyncadd [#allocation3], 4294967168 }
  0xca   :  { %133 = vsyncpa [#allocation3], 1 }

</bundles_post_ra>
